<compile_context>
chip_gen: v5e
topology: v5e:2x2
jax: 0.10.0
libtpu: 0.0.40
codegen_flags: <defaults>
</compile_context>

<pallas_src>
import numpy as np
import jax
import jax.numpy as jnp
from jax.experimental import pallas as pl
from jax.experimental.pallas import tpu as pltpu


# --------------------------------------------------------------------------- #
# Setup glue: sinusoidal table, identical math to the PyTorch __init__.
# --------------------------------------------------------------------------- #
def make_positional_encoding(d_model: int, max_len: int = 1000) -> jnp.ndarray:
    position = np.arange(0, max_len, dtype=np.float32)[:, None]          # (max_len, 1)
    div_term = np.exp(
        np.arange(0, d_model, 2, dtype=np.float32) * (-np.log(10000.0) / d_model)
    )                                                                    # (ceil(d/2),)
    pe = np.zeros((max_len, d_model), dtype=np.float32)
    pe[:, 0::2] = np.sin(position * div_term)
    pe[:, 1::2] = np.cos(position * div_term)[:, : d_model // 2]         # robust for odd d_model
    return jnp.asarray(pe)                                               # (max_len, d_model)


# --------------------------------------------------------------------------- #
# Kernel body.
# --------------------------------------------------------------------------- #
def _pe_add_kernel(x_ref, pe_ref, o_ref):
    # x_ref/o_ref: (tB, tS, D); pe_ref: (1, tS, D).
    # Leading-dim broadcast add: no cross-lane / cross-sublane movement (VPU only),
    # explicit downcast on store.
    o_ref[...] = (x_ref[...] + pe_ref[...]).astype(o_ref.dtype)


# --------------------------------------------------------------------------- #
# Tiling helpers.
# --------------------------------------------------------------------------- #
def _cdiv(a: int, b: int) -> int:
    return -(-a // b)


def _round_down(v: int, m: int) -> int:
    return max(m, (v // m) * m)


def _round_up(v: int, m: int) -> int:
    return ((v + m - 1) // m) * m


def _sublane(itemsize: int) -> int:
    # Sublane packing granularity for the second-to-last block dim.
    return {1: 32, 2: 16, 4: 8}.get(itemsize, 8)


def _per_array_tile_budget() -> int:
    """Chip-aware per-array tile budget in bytes."""
    vmem = 128 * 1024 * 1024
    try:
        vmem = int(getattr(pltpu.get_tpu_info(), "vmem_capacity_bytes", vmem))
    except Exception:
        pass
    # v7x: 64 MiB physical VMEM but 3.2 TB/s HBM -> 8 MiB tiles amortize the
    # ~0.35 us per-step overhead (3 arrays x 2 buffers x 8 MiB = 48 MiB fits).
    # v5e/v6e (128 MiB VMEM, <= ~1.4 TB/s): 4 MiB already sits at ~86% roofline.
    if vmem <= 64 * 1024 * 1024:
        return 8 * 1024 * 1024
    return 4 * 1024 * 1024


def _choose_tiles(B: int, S: int, D: int, itemsize: int, budget: int):
    """Pick (tB, tS): x/out blocks are (tB, tS, D), pe blocks are (1, tS, D)."""
    sub = _sublane(itemsize)
    row_bytes = D * itemsize              # one sequence position
    slab_bytes = S * row_bytes            # one full batch element

    if slab_bytes <= budget:
        # Whole sequence per block; pack as many batch elements as the budget allows.
        tS = S
        tB = max(1, min(B, budget // max(1, slab_bytes)))
    else:
        # One batch element, tile over the sequence axis (tS multiple of the
        # sublane packing; partial last block is masked by Pallas).
        tB = 1
        tS = _round_down(budget // max(1, row_bytes), sub)
        tS = min(tS, _round_up(S, sub))
    return tB, tS


# --------------------------------------------------------------------------- #
# Forward wrapper.
# --------------------------------------------------------------------------- #
def positional_encoding_forward(x: jnp.ndarray, pe_table: jnp.ndarray) -> jnp.ndarray:
    """x: (B, S, D); pe_table: (max_len, D) float32. Returns x + pe[:S] in x.dtype."""
    B, S, D = x.shape
    assert S <= pe_table.shape[0] and D == pe_table.shape[1]

    dtype = x.dtype
    itemsize = jnp.dtype(dtype).itemsize
    # Cast pe to x's dtype in the wrapper: exact for f32 inputs, and halves pe's
    # HBM traffic / double-buffered VMEM footprint for bf16 activations.
    pe3 = pe_table[:S, :].astype(dtype).reshape(1, S, D)   # cheap static slice (glue)

    budget = _per_array_tile_budget()
    tB, tS = _choose_tiles(B, S, D, itemsize, budget)
    n_s = _cdiv(S, tS)
    n_b = _cdiv(B, tB)

    # Megacore (v7x has 2 TensorCores, each with its own DMA streams): make sure
    # there are >=2 independent blocks when the problem is big enough to matter.
    tile_bytes = tB * tS * D * itemsize
    if n_s * n_b == 1 and tile_bytes > 512 * 1024:
        if B >= 2:
            tB = _cdiv(B, 2)
            n_b = _cdiv(B, tB)
        else:
            sub = _sublane(itemsize)
            half = _round_up(_cdiv(tS, 2), sub)
            if half < S:
                tS = half
                n_s = _cdiv(S, tS)

    x_tile_bytes = tB * tS * D * itemsize
    pe_tile_bytes = tS * D * itemsize
    vmem_limit = min(
        56 * 1024 * 1024,   # stay comfortably under v7x's 64 MiB physical VMEM
        max(16 * 1024 * 1024,
            2 * (2 * x_tile_bytes + pe_tile_bytes) + 4 * 1024 * 1024),
    )

    cost = pl.CostEstimate(
        flops=B * S * D,
        transcendentals=0,
        bytes_accessed=2 * B * S * D * itemsize + S * D * itemsize,
    )

    return pl.pallas_call(
        _pe_add_kernel,
        out_shape=jax.ShapeDtypeStruct((B, S, D), dtype),
        # Sequence-tile axis OUTER, batch-tile axis INNER: pe's block index only
        # depends on the outer axis, so its block stays VMEM-resident across the
        # inner batch sweep (no redundant HBM reads of pe).
        grid=(n_s, n_b),
        in_specs=[
            pl.BlockSpec((tB, tS, D), lambda i, b: (b, i, 0)),   # x tile
            pl.BlockSpec((1, tS, D), lambda i, b: (0, i, 0)),    # pe (shared across batch)
        ],
        out_specs=pl.BlockSpec((tB, tS, D), lambda i, b: (b, i, 0)),
        compiler_params=pltpu.CompilerParams(
            dimension_semantics=("parallel", "parallel"),
            vmem_limit_bytes=vmem_limit,
        ),
        cost_estimate=cost,
    )(x, pe3)


# --------------------------------------------------------------------------- #
# Demo / correctness check.
# --------------------------------------------------------------------------- #
if __name__ == "__main__":
    # Small shapes consistent with the module: batch=2, seq=8, d_model=32.
    B, S, D = 2, 8, 32
    max_len = 1000

    key = jax.random.PRNGKey(0)
    x = jax.random.normal(key, (B, S, D), dtype=jnp.float32)

    pe_table = make_positional_encoding(D, max_len)

    out = jax.block_until_ready(positional_encoding_forward(x, pe_table))

    # Reference check (pure JAX, same semantics as the PyTorch forward).
    ref = x + pe_table[None, :S, :]
    np.testing.assert_allclose(np.asarray(out), np.asarray(ref), rtol=1e-6, atol=1e-6)

    print("KERNEL_OK")
</pallas_src>

<mosaic_0001>
module attributes {stable_mosaic.version = 11 : i64} {
  func.func @_pe_add_kernel(%arg0: i32, %arg1: i32, %arg2: memref<2x8x32xf32, #tpu.memory_space<vmem>>, %arg3: memref<1x8x32xf32, #tpu.memory_space<vmem>>, %arg4: memref<2x8x32xf32, #tpu.memory_space<vmem>>) attributes {dimension_semantics = [#tpu.dimension_semantics<parallel>, #tpu.dimension_semantics<parallel>], iteration_bounds = array<i64: 1, 1>, scalar_prefetch = 0 : i64, scratch_operands = 0 : i64, tpu.core_type = #tpu.core_type<tc>, window_params = [{transform_indices = @transform_0, window_bounds = array<i64: 2, 8, 32>}, {transform_indices = @transform_1, window_bounds = array<i64: 1, 8, 32>}, {transform_indices = @transform_2, window_bounds = array<i64: 2, 8, 32>}]} {
    %c0 = arith.constant 0 : index
    %c0_0 = arith.constant 0 : index
    %c0_1 = arith.constant 0 : index
    %0 = vector.load %arg2[%c0, %c0_0, %c0_1] : memref<2x8x32xf32, #tpu.memory_space<vmem>>, vector<2x8x32xf32>
    %c0_2 = arith.constant 0 : index
    %c0_3 = arith.constant 0 : index
    %c0_4 = arith.constant 0 : index
    %1 = vector.load %arg3[%c0_2, %c0_3, %c0_4] : memref<1x8x32xf32, #tpu.memory_space<vmem>>, vector<1x8x32xf32>
    %2 = vector.broadcast %1 : vector<1x8x32xf32> to vector<2x8x32xf32>
    %3 = arith.addf %0, %2 : vector<2x8x32xf32>
    %c0_5 = arith.constant 0 : index
    %c0_6 = arith.constant 0 : index
    %c0_7 = arith.constant 0 : index
    %4 = vector.load %arg4[%c0_5, %c0_6, %c0_7] : memref<2x8x32xf32, #tpu.memory_space<vmem>>, vector<2x8x32xf32>
    tpu.vector_store %arg4[%c0_5, %c0_6, %c0_7], %3 {strides = array<i32>} : memref<2x8x32xf32, #tpu.memory_space<vmem>>, vector<2x8x32xf32>,
    return
  }
  func.func @transform_0(%arg0: i32, %arg1: i32) -> (i32, i32, i32) {
    %c0_i32 = arith.constant 0 : i32
    %c0_i32_0 = arith.constant 0 : i32
    return %arg1, %arg0, %c0_i32 : i32, i32, i32
  }
  func.func @transform_1(%arg0: i32, %arg1: i32) -> (i32, i32, i32) {
    %c0_i32 = arith.constant 0 : i32
    %c0_i32_0 = arith.constant 0 : i32
    %c0_i32_1 = arith.constant 0 : i32
    return %c0_i32, %arg0, %c0_i32_0 : i32, i32, i32
  }
  func.func @transform_2(%arg0: i32, %arg1: i32) -> (i32, i32, i32) {
    %c0_i32 = arith.constant 0 : i32
    %c0_i32_0 = arith.constant 0 : i32
    return %arg1, %arg0, %c0_i32 : i32, i32, i32
  }
}

</mosaic_0001>

<bundles_post_ra>
// kernel: tpu_custom_call.1
= control target key start
LH: loop header
LB: loop body
LE: loop exit
PB: predicated region body
PF: predicated region fallthrough
CT: control target
= control target key end

     0   :  { %7 = vsyncpa [#allocation3], 0  ;;  %s182_s0 = inlined_call_operand.hbm [shape: f32[2,8,32], index: 0, kind: input, shape index: {}]   ;;  %s183_s1 = inlined_call_operand.hbm [shape: f32[1,8,32], index: 1, kind: input, shape index: {}]   ;;  %s184_s2 = inlined_call_operand.hbm [shape: f32[2,8,32], index: 2, kind: output, shape index: {}]  }
   0x1   :  { %8 = vsyncpa [#allocation6], 0 }
   0x2   :  { %9 = vsyncpa [#allocation4], 0  ;;  %s14_s11 = sshll.u32 %s182_s0, 4  ;;  %s153_s12 = smov [#allocation2]   ;;  %s15_s11 = int_to_ptr.hbm [resolvable:$true] %s14_s11 }
   0x3   :  { %s16_s13 = sshll.u32 %s153_s12, 4  ;;  %s28_s16 = sshll.u32 %s183_s1, 4  ;;  %s17_s13 = int_to_ptr.vmem [resolvable:$true] %s16_s13  ;;  %s29_s16 = int_to_ptr.hbm [resolvable:$true] %s28_s16 }
   0x4   :  { %s154_s17 = smov 128   ;;  %s155_s18 = smov 8  }
   0x5   :  { %22 = dma.hbm_to_vmem [thread:$0]  %s15_s11, 256, %s17_s13, [#allocation3], %s154_s17, %s154_s17, %s155_s18  }
   0x6   :  { %s156_s19 = smov [#allocation5]  }
   0x7   :  { %s30_s20 = sshll.u32 %s156_s19, 4  ;;  %s31_s20 = int_to_ptr.vmem [resolvable:$true] %s30_s20 }
   0x8   :  { %33 = dma.hbm_to_vmem [thread:$0]  %s29_s16, 128, %s31_s20, [#allocation6]  }
   0x9   :  { %147 = dma.done.wait [#allocation3], 256  }
   0xa   :  { %148 = vsyncadd [#allocation3], 4294967040 }
   0xb   :  { %149 = dma.done.wait [#allocation6], 128  }
   0xc   :  { %150 = vsyncadd [#allocation6], 4294967168  ;;  %s157_s0 = smov [#allocation7]   ;;  %s56_s24 = sshll.u32 %s184_s2, 4  ;;  %v42_v0 = vld [vmem:[#allocation2] sm:$0xff]  ;;  %v44_v1 = vld [vmem:[#allocation5] sm:$0xff]  ;;  %s57_s24 = int_to_ptr.hbm [resolvable:$true] %s56_s24 }
   0xd   :  { %s54_s21 = sshll.u32 %s157_s0, 4  ;;  %vm47_vm0 = vcmask 261120   ;;  %v43_v2 = vld [vmem:[#allocation2 + $0x8] sm:$0xff]  ;;  %v45_v3 = vadd.f32 %v44_v1, %v42_v0  ;;  %s55_s21 = int_to_ptr.vmem [resolvable:$true] %s54_s21 }
   0xe   :  { %v46_v4 = vadd.f32 %v44_v1, %v43_v2 }
   0xf   :  { %48 = vst.msk [vmem:[#allocation7] sm:$0xff] %vm47_vm0, %v45_v3 }
  0x10   :  { %49 = vst.msk [vmem:[#allocation7 + $0x8] sm:$0xff] %vm47_vm0, %v46_v4 }
  0x11   :  { %62 = dma.vmem_to_hbm [thread:$0]  %s55_s21, 256, %s57_s24, [#allocation4], %s154_s17, %s154_s17, %s155_s18  }
  0x12   :  { %151 = dma.done.wait [#allocation4], 256  }
  0x13   :  { %152 = vsyncadd [#allocation4], 4294967040 }
  0x14   :  { %67 = vsyncpa [#allocation3], 1 }
  0x15   :  { %68 = vsyncpa [#allocation6], 1 }
  0x16   :  { %69 = vsyncpa [#allocation4], 1 }

</bundles_post_ra>
